<compile_context>
chip_gen: v6e
topology: v6e:2x2x1
jax: 0.10.0
libtpu: 0.0.40
codegen_flags: <defaults>
</compile_context>

<pallas_src>
import jax
import jax.numpy as jnp
from jax import lax
from jax.experimental import pallas as pl
from jax.experimental.pallas import tpu as pltpu


# ---------------------------------------------------------------------------
# Pallas kernels: Gram matrix  A = W^T @ W  (contraction over output channels)
# The wrapper passes wt = W.T of shape (I, O); both kernels contract the last
# dim of both operands (same pattern as q @ k.T in flash attention), so no
# transpose is materialized inside the kernel.
# ---------------------------------------------------------------------------
def _gram_single_kernel(wt_ref, a_ref):
    # grid = (O // tk,): pure reduction over the output-channel axis.
    # A single input ref serves both dot operands (review #1: halves DMA).
    @pl.when(pl.program_id(0) == 0)
    def _():
        a_ref[...] = jnp.zeros_like(a_ref)

    blk = wt_ref[...]                                   # (I, tk) f32
    a_ref[...] += lax.dot_general(                      # A += blk @ blk.T
        blk, blk,
        dimension_numbers=(((1,), (1,)), ((), ())),
        preferred_element_type=jnp.float32,
    )


def _gram_tri_kernel(bi_ref, bj_ref, wl_ref, wr_ref, a_ref):
    # grid = (num_upper_blocks, O // tk); reduction axis last.
    # bi/bj are scalar-prefetched block coordinates of the upper triangle.
    @pl.when(pl.program_id(1) == 0)
    def _():
        a_ref[...] = jnp.zeros_like(a_ref)

    a_ref[...] += lax.dot_general(                      # (tm,tk)x(tn,tk)->(tm,tn)
        wl_ref[...], wr_ref[...],
        dimension_numbers=(((1,), (1,)), ((), ())),
        preferred_element_type=jnp.float32,
    )


# ---------------------------------------------------------------------------
# Tile / VMEM heuristics (review v7x / v6e / v5e items)
# ---------------------------------------------------------------------------
def _pick_block(i_dim):
    # Lane-dense multiple-of-128 tiles with >= 2 parallel grid steps when the
    # Gram is big enough (keeps v7x's 2nd TensorCore busy); otherwise one block.
    for cand in (256, 128):
        if i_dim % cand == 0 and i_dim // cand >= 2:
            return cand
    return i_dim


def _pick_k(o_dim):
    if o_dim <= 2048:
        return o_dim
    for cand in (2048, 1024, 512, 256, 128):
        if o_dim % cand == 0:
            return cand
    return o_dim


def _vmem_limit(est_bytes, user_limit):
    if user_limit is not None:
        return user_limit
    if est_bytes <= (24 << 20):          # fits the default scoped VMEM everywhere
        return None
    return min(est_bytes + (8 << 20), 64 << 20)   # cap at v7x physical VMEM


# ---------------------------------------------------------------------------
# Gram-matrix wrapper
# ---------------------------------------------------------------------------
def gram_matrix(w, *, tm=None, tn=None, tk=None, vmem_limit_bytes=None):
    """A = w.T @ w for w of shape (O, I), computed with Pallas TPU kernels."""
    O, I = w.shape
    w = w.astype(jnp.float32)
    # One cheap XLA transpose in the wrapper so the kernels never need an
    # in-kernel (XLU) relayout (review #2).
    wt = w.T                                            # (I, O)

    blk = _pick_block(I)
    tm = blk if tm is None else tm
    tn = blk if tn is None else tn
    tk = _pick_k(O) if tk is None else tk
    assert I % tm == 0 and I % tn == 0 and O % tk == 0
    kt = O // tk

    if tm == I and tn == I:
        # ---- single-block path: one input, output block = the accumulator ----
        est = 2 * I * tk * 4 + 2 * I * I * 4            # dbl-buffered input + out
        return pl.pallas_call(
            _gram_single_kernel,
            out_shape=jax.ShapeDtypeStruct((I, I), jnp.float32),
            grid_spec=pltpu.PrefetchScalarGridSpec(
                num_scalar_prefetch=0,
                grid=(kt,),
                in_specs=[pl.BlockSpec((I, tk), lambda k: (0, k))],
                out_specs=pl.BlockSpec((I, I), lambda k: (0, 0)),
            ),
            compiler_params=pltpu.CompilerParams(
                dimension_semantics=("arbitrary",),
                vmem_limit_bytes=_vmem_limit(est, vmem_limit_bytes),
            ),
        )(wt)

    # ---- tiled path: only upper-triangular (i <= j) block pairs -------------
    assert tm == tn, "triangular block enumeration needs square output tiles"
    T = I // tm
    pairs = [(i, j) for i in range(T) for j in range(i, T)]
    bi = jnp.asarray([p[0] for p in pairs], dtype=jnp.int32)
    bj = jnp.asarray([p[1] for p in pairs], dtype=jnp.int32)

    # VMEM accounting (review, v7x): 2 inputs x 2 buffers x block + 2 x output.
    est = 2 * (tm * tk + tn * tk) * 4 + 2 * tm * tn * 4

    a_u = pl.pallas_call(
        _gram_tri_kernel,
        out_shape=jax.ShapeDtypeStruct((I, I), jnp.float32),
        grid_spec=pltpu.PrefetchScalarGridSpec(
            num_scalar_prefetch=2,
            grid=(len(pairs), kt),
            in_specs=[
                pl.BlockSpec((tm, tk), lambda p, k, bi, bj: (bi[p], k)),
                pl.BlockSpec((tn, tk), lambda p, k, bi, bj: (bj[p], k)),
            ],
            out_specs=pl.BlockSpec((tm, tn), lambda p, k, bi, bj: (bi[p], bj[p])),
        ),
        compiler_params=pltpu.CompilerParams(
            # p axis: independent output blocks -> shards across v7x's 2 TCs;
            # k axis: reduction into the resident output block -> arbitrary.
            dimension_semantics=("parallel", "arbitrary"),
            vmem_limit_bytes=_vmem_limit(est, vmem_limit_bytes),
        ),
    )(bi, bj, wt, wt)

    # Mirror the (never-written) lower-triangular blocks from the transposed
    # upper blocks.  Diagonal blocks are computed in full, so a block-level
    # mask is exact.
    rb = lax.broadcasted_iota(jnp.int32, (I, I), 0) // tm
    cb = lax.broadcasted_iota(jnp.int32, (I, I), 1) // tn
    return jnp.where(rb <= cb, a_u, a_u.T)


# ---------------------------------------------------------------------------
# Forward pass mirroring LogDetDivergence.forward()
# ---------------------------------------------------------------------------
def logdet_divergence(weight_oihw, *, exact_trace=False, use_cholesky=True,
                      force_pallas=False, min_pallas_dim=256,
                      tm=None, tn=None, tk=None, vmem_limit_bytes=None):
    # squeeze the two trailing 1x1 spatial dims of the conv weight
    w = jnp.squeeze(jnp.squeeze(weight_oihw, axis=3), axis=2)       # (O, I)
    w = w.astype(jnp.float32)
    O, I = w.shape

    # Size-gated dispatch (review #9): the Pallas Gram only wins once the
    # matmul amortizes the launch; tiny Grams stay in XLA so they fuse with
    # the log-det prologue.
    if force_pallas or I >= min_pallas_dim:
        a = gram_matrix(w, tm=tm, tn=tn, tk=tk,
                        vmem_limit_bytes=vmem_limit_bytes)
    else:
        a = jnp.dot(w.T, w, preferred_element_type=jnp.float32)

    # TODO(synk): Cholesky/LU factorizations have no clean Pallas TPU
    # equivalent; the log-determinant stays in jnp.linalg.
    if use_cholesky:
        # A = W^T W is SPD whenever torch.inverse/logdet succeed; Cholesky is
        # ~2x fewer flops than LU and avoids partial pivoting's serial scalar
        # path on TPU (review #7: LU dominated end-to-end latency).
        chol = jnp.linalg.cholesky(a)
        d = jnp.diagonal(chol)
        ok = jnp.all(jnp.isfinite(d)) & jnp.all(d > 0)
        log_det = jnp.where(
            ok, 2.0 * jnp.sum(jnp.log(jnp.where(d > 0, d, 1.0))), -jnp.inf)
        # NOTE: numerically degenerate A maps to -inf here; the slogdet path
        # below reproduces torch.logdet's -inf/NaN split exactly if needed.
    else:
        sign, logabs = jnp.linalg.slogdet(a)
        log_det = jnp.where(sign > 0, logabs,
                            jnp.where(sign == 0, -jnp.inf, jnp.nan))

    if exact_trace:
        # Literal torch form trace(A @ inv(A)), computed as sum(A * inv(A))
        # (A and inv(A) are symmetric) — fused by XLA, no extra kernel launch.
        a_inv = jnp.linalg.inv(a)
        trace_ = jnp.sum(a * a_inv)
    else:
        # trace(A @ inv(A)) == I exactly whenever inv(A) exists (the only case
        # in which the PyTorch op does not error), so the LU inverse is dropped.
        trace_ = jnp.float32(I)

    return trace_ - log_det


if __name__ == "__main__":
    key = jax.random.PRNGKey(0)
    k_small, k_big = jax.random.split(key)

    # ---- small case (1x1 conv weight, Gram is 32x32) ------------------------
    O1, I1 = 64, 32
    w1 = 0.1 * jax.random.normal(k_small, (O1, I1, 1, 1), dtype=jnp.float32)
    w1 = w1 + jnp.eye(O1, I1, dtype=jnp.float32)[:, :, None, None]   # SPD Gram

    m1 = w1[:, :, 0, 0]
    a1 = m1.T @ m1
    ref1 = jnp.trace(a1 @ jnp.linalg.inv(a1)) - jnp.linalg.slogdet(a1)[1]

    # default: size-gated (fused XLA Gram at this size) + Cholesky logdet
    loss1 = jax.block_until_ready(logdet_divergence(w1))
    assert jnp.allclose(loss1, ref1, rtol=1e-3, atol=1e-3), (loss1, ref1)

    # forced Pallas path: single-input, single-block Gram kernel
    loss1p = jax.block_until_ready(logdet_divergence(w1, force_pallas=True))
    assert jnp.allclose(loss1p, ref1, rtol=1e-3, atol=1e-3), (loss1p, ref1)

    # literal torch formulation (LU inverse + elementwise trace + slogdet)
    loss1e = jax.block_until_ready(
        logdet_divergence(w1, force_pallas=True, exact_trace=True,
                          use_cholesky=False))
    assert jnp.allclose(loss1e, ref1, rtol=1e-3, atol=1e-3), (loss1e, ref1)

    # ---- larger channel count: tiled, upper-triangular Pallas Gram ----------
    O2, I2 = 512, 256
    w2 = 0.05 * jax.random.normal(k_big, (O2, I2, 1, 1), dtype=jnp.float32)
    w2 = w2 + jnp.eye(O2, I2, dtype=jnp.float32)[:, :, None, None]

    m2 = w2[:, :, 0, 0]
    a2_ref = m2.T @ m2
    a2 = jax.block_until_ready(gram_matrix(m2))          # triangular kernel
    assert jnp.allclose(a2, a2_ref, rtol=1e-4, atol=1e-3), "gram mismatch"

    ref2 = jnp.float32(I2) - jnp.linalg.slogdet(a2_ref)[1]
    loss2 = jax.block_until_ready(logdet_divergence(w2))  # auto-Pallas (I>=256)
    assert jnp.allclose(loss2, ref2, rtol=1e-3, atol=1e-3), (loss2, ref2)

    print("KERNEL_OK")
</pallas_src>

<mosaic_0001>
module attributes {stable_mosaic.version = 11 : i64} {
  func.func @_gram_single_kernel(%arg0: i32, %arg1: memref<32x64xf32, #tpu.memory_space<vmem>>, %arg2: memref<32x32xf32, #tpu.memory_space<vmem>>) attributes {dimension_semantics = [#tpu.dimension_semantics<arbitrary>], iteration_bounds = array<i64: 1>, scalar_prefetch = 0 : i64, scratch_operands = 0 : i64, tpu.core_type = #tpu.core_type<tc>, window_params = [{transform_indices = @transform_0, window_bounds = array<i64: 32, 64>}, {pipeline_mode = #tpu.pipeline_mode<synchronous>, transform_indices = @transform_1, window_bounds = array<i64: 32, 32>}]} {
    %c0_i32 = arith.constant 0 : i32
    %0 = arith.cmpi eq, %arg0, %c0_i32 : i32
    %1 = arith.extui %0 : i1 to i32
    %c0_i32_0 = arith.constant 0 : i32
    %2 = arith.cmpi ne, %1, %c0_i32_0 : i32
    scf.if %2 {
      %cst_6 = arith.constant 0.000000e+00 : f32
      %8 = vector.broadcast %cst_6 : f32 to vector<32x32xf32>
      %c0_7 = arith.constant 0 : index
      %c0_8 = arith.constant 0 : index
      %9 = vector.load %arg2[%c0_7, %c0_8] : memref<32x32xf32, #tpu.memory_space<vmem>>, vector<32x32xf32>
      tpu.vector_store %arg2[%c0_7, %c0_8], %8 {strides = array<i32>} : memref<32x32xf32, #tpu.memory_space<vmem>>, vector<32x32xf32>,
    } else {
    }
    %c0 = arith.constant 0 : index
    %c0_1 = arith.constant 0 : index
    %3 = vector.load %arg1[%c0, %c0_1] : memref<32x64xf32, #tpu.memory_space<vmem>>, vector<32x64xf32>
    %c0_2 = arith.constant 0 : index
    %c0_3 = arith.constant 0 : index
    %4 = vector.load %arg2[%c0_2, %c0_3] : memref<32x32xf32, #tpu.memory_space<vmem>>, vector<32x32xf32>
    %cst = arith.constant dense<0.000000e+00> : vector<32x32xf32>
    %5 = tpu.matmul %3, %3, %cst {dimension_numbers = #tpu.dot_dimension_numbers<[1], [1], [0], [0], [0, 0, 1, 0], [], []>} : vector<32x64xf32>, vector<32x64xf32>, vector<32x32xf32> -> vector<32x32xf32>
    %6 = arith.addf %4, %5 : vector<32x32xf32>
    %c0_4 = arith.constant 0 : index
    %c0_5 = arith.constant 0 : index
    %7 = vector.load %arg2[%c0_4, %c0_5] : memref<32x32xf32, #tpu.memory_space<vmem>>, vector<32x32xf32>
    tpu.vector_store %arg2[%c0_4, %c0_5], %6 {strides = array<i32>} : memref<32x32xf32, #tpu.memory_space<vmem>>, vector<32x32xf32>,
    return
  }
  func.func @transform_0(%arg0: i32) -> (i32, i32) {
    %c0_i32 = arith.constant 0 : i32
    %c0_i32_0 = arith.constant 0 : i32
    return %c0_i32, %arg0 : i32, i32
  }
  func.func @transform_1(%arg0: i32) -> (i32, i32) {
    %c0_i32 = arith.constant 0 : i32
    %c0_i32_0 = arith.constant 0 : i32
    %c0_i32_1 = arith.constant 0 : i32
    return %c0_i32, %c0_i32_0 : i32, i32
  }
}

</mosaic_0001>

<bundles_post_ra>
// kernel: tpu_custom_call.1
= control target key start
LH: loop header
LB: loop body
LE: loop exit
PB: predicated region body
PF: predicated region fallthrough
CT: control target
= control target key end

     0   :  { %6 = vsyncpa [#allocation3], 0  ;;  %s306_s0 = inlined_call_operand.hbm [shape: f32[32,64], index: 0, kind: input, shape index: {}]   ;;  %s307_s1 = inlined_call_operand.hbm [shape: f32[32,32], index: 1, kind: output, shape index: {}]  }
   0x1   :  { %7 = vsyncpa [#allocation4], 0  ;;  %s251_s6 = smov [#allocation2]  }
   0x2   :  { %s13_s7 = sshll.u32 %s251_s6, 4  ;;  %s14_s7 = int_to_ptr.vmem [resolvable:$true] %s13_s7 }
   0x3   :  { %s215_s8 = scalar_lea.vmem %s14_s7, 512  ;;  %p220_p1 = scmp.lt.s32.totalorder %s14_s7, %s14_s7 }
   0x4   :  { %p216_p0 = scmp.ne.s32.totalorder %s14_s7, %s215_s8  ;;  %p221_p2 = scmp.lt.s32.totalorder %s215_s8, %s215_s8 }
   0x6   :  { %p222_p3 = por %p221_p2, %p220_p1 }
   0x8   :  { %p223_p4 = pnand %p222_p3, %p216_p0 }
   0xa   :  { %226 = shalt.err (!%p223_p4)
}
   0xb   :  { %s252_s9 = smov 128   ;;  %s253_s10 = smov 8  }
   0xc   :  { %19 = dma.hbm_to_vmem [thread:$0]  %s306_s0, 512, %s14_s7, [#allocation3], %s252_s9, %s252_s9, %s253_s10  }
   0xd   :  { %247 = dma.done.wait [#allocation3], 512  }
   0xe   :  { %248 = vsyncadd [#allocation3], 4294966784  ;;  %vm27_vm0 = vcmask 261120   ;;  %v254_v0 = vmov 0.0   ;;  %vm40_vm1 = vcmask 523264   ;;  %v35_v1 = vld [vmem:[#allocation2 + $0x18] sm:$0xff] }
   0xf   :  { %29 = vst.msk [vmem:[#allocation5 + $0x8] sm:$0xff] %vm27_vm0, %v254_v0  ;;  %28 = vst.msk [vmem:[#allocation5] sm:$0xff] %vm27_vm0, %v254_v0  ;;  %v34_v2 = vld [vmem:[#allocation2 + $0x10] sm:$0xff]  ;;  %180 = vmatprep.subr.msk.mxu0 %vm40_vm1, %v35_v1  ;;  %194 = vmatprep.subr.msk.mxu1 %vm40_vm1, %v35_v1  ;;  %v32_v3 = vld [vmem:[#allocation2] sm:$0xff]  ;;  %s255_s0 = smov [#allocation5]  }
  0x10   :  { %30 = vst.msk [vmem:[#allocation5 + $0x10] sm:$0xff] %vm27_vm0, %v254_v0  ;;  %31 = vst.msk [vmem:[#allocation5 + $0x18] sm:$0xff] %vm27_vm0, %v254_v0  ;;  %181 = vmatpush3.xpose.msk.msra.mxu0 %vm40_vm1, %v35_v1  ;;  %198 = vmatpush3.xpose.msk.msra.mxu1 %vm40_vm1, %v35_v1  ;;  %v33_v4 = vld [vmem:[#allocation2 + $0x8] sm:$0xff]  ;;  %s152_s13 = sshll.u32 %s255_s0, 4  ;;  %s153_s13 = int_to_ptr.vmem [resolvable:$true] %s152_s13 }
  0x11   :  { %182 = vmatprep.subr.msk.mxu0 %vm40_vm1, %v34_v2  ;;  %195 = vmatprep.subr.msk.mxu1 %vm40_vm1, %v34_v2  ;;  %s227_s14 = scalar_lea.vmem %s153_s13, 512  ;;  %p232_p6 = scmp.lt.s32.totalorder %s153_s13, %s153_s13 }
  0x12   :  { %188 = vmatprep.mubr.msk.f32.mxu0 %vm40_vm1, %v32_v3  ;;  %191 = vmatprep.mubr.msk.f32.mxu1 %vm40_vm1, %v34_v2  ;;  %p228_p5 = scmp.ne.s32.totalorder %s153_s13, %s227_s14  ;;  %p233_p7 = scmp.lt.s32.totalorder %s227_s14, %s227_s14 }
  0x14   :  { %183 = vmatpush3.xpose.msk.msra.mxu0 %vm40_vm1, %v34_v2  ;;  %199 = vmatpush3.xpose.msk.msra.mxu1 %vm40_vm1, %v34_v2  ;;  %p234_p8 = por %p233_p7, %p232_p6 }
  0x15   :  { %184 = vmatprep.subr.msk.mxu0 %vm40_vm1, %v33_v4  ;;  %196 = vmatprep.subr.msk.mxu1 %vm40_vm1, %v33_v4 }
  0x16   :  { %v37_v5 = vld [vmem:[#allocation5 + $0x8] sm:$0xff]  ;;  %v36_v9 = vld [vmem:[#allocation5] sm:$0xff]  ;;  %p235_p9 = pnand %p234_p8, %p228_p5 }
  0x17   :  { %v39_v6 = vld [vmem:[#allocation5 + $0x18] sm:$0xff]  ;;  %v38_v10 = vld [vmem:[#allocation5 + $0x10] sm:$0xff] }
  0x18   :  { %185 = vmatpush3.xpose.msk.msra.mxu0 %vm40_vm1, %v33_v4  ;;  %200 = vmatpush3.xpose.msk.msra.mxu1 %vm40_vm1, %v33_v4 }
  0x19   :  { %186 = vmatprep.subr.msk.mxu0 %vm40_vm1, %v32_v3  ;;  %197 = vmatprep.subr.msk.mxu1 %vm40_vm1, %v32_v3 }
  0x1c   :  { %187 = vmatpush3.xpose.msk.msra.mxu0 %vm40_vm1, %v32_v3  ;;  %201 = vmatpush3.xpose.msk.msra.mxu1 %vm40_vm1, %v32_v3 }
  0x1f   :  { %189 = vmatmul.mubr.msk.f32.vlgmr.msra.gmra.mxu0 %vm40_vm1, %v33_v4  ;;  %192 = vmatmul.mubr.msk.f32.vlgmr.msra.gmra.mxu1 %vm40_vm1, %v35_v1 }
  0xdf   :  { %v190_v7 = vpop.f32.mrf.mxu0  ;;  %v193_v8 = vpop.f32.mrf.mxu1 }
  0xe0   :  { %v139_v11 = vadd.f32 %v190_v7, %v37_v5  ;;  %v141_v12 = vadd.f32 %v193_v8, %v39_v6 }
  0xe1   :  { %v119_v13 = vpop.f32.mrf.mxu0  ;;  %v129_v14 = vpop.f32.mrf.mxu1 }
  0xe2   :  { %144 = vst.msk [vmem:[#allocation5 + $0x8] sm:$0xff] %vm27_vm0, %v139_v11  ;;  %146 = vst.msk [vmem:[#allocation5 + $0x18] sm:$0xff] %vm27_vm0, %v141_v12  ;;  %v138_v15 = vadd.f32 %v119_v13, %v36_v9  ;;  %v140_v16 = vadd.f32 %v129_v14, %v38_v10 }
  0xe4   :  { %143 = vst.msk [vmem:[#allocation5] sm:$0xff] %vm27_vm0, %v138_v15  ;;  %145 = vst.msk [vmem:[#allocation5 + $0x10] sm:$0xff] %vm27_vm0, %v140_v16 }
  0xe5   :  { %238 = shalt.err (!%p235_p9)
}
  0xe6   :  { %158 = dma.vmem_to_hbm [thread:$0]  %s153_s13, 512, %s307_s1, [#allocation4], %s252_s9, %s252_s9, %s253_s10  }
  0xe7   :  { %249 = dma.done.wait [#allocation4], 512  }
  0xe8   :  { %250 = vsyncadd [#allocation4], 4294966784 }
  0xe9   :  { %162 = vsyncpa [#allocation3], 1 }
  0xea   :  { %163 = vsyncpa [#allocation4], 1 }

</bundles_post_ra>
